<compile_context>
chip_gen: v5e
topology: v5e:2x2
jax: 0.10.0
libtpu: 0.0.40
codegen_flags: <defaults>
</compile_context>

<pallas_src>
import numpy as np

import jax
import jax.numpy as jnp
from jax.experimental import pallas as pl
from jax.experimental.pallas import tpu as pltpu


# ---------------------------------------------------------------------------
# Fused kernel: im2col conv (all filter sizes) + mask + max-pool + ReLU +
#               Linear + softmax.  Everything stays in VMEM/vregs; only the
#               (Bt, O_pad) softmax tile is stored to HBM.
# ---------------------------------------------------------------------------
def _fused_textcnn_kernel(doc_ref, wconv_ref, bconv_ref, mask_ref,
                          fcw_ref, fcb_ref, out_ref):
    # doc_ref:   (Bt, L, E)        f32
    # wconv_ref: (max_fs*E, Ftot)  bf16  (branch f zero for taps k >= fsize_f)
    # bconv_ref: (1, Ftot)         f32
    # mask_ref:  (L, Ftot)         f32   additive {0, -1e30} validity mask
    # fcw_ref:   (Ftot, O_pad)     bf16  (zero in padded class lanes)
    # fcb_ref:   (1, O_pad)        f32   (-1e30 in padded class lanes)
    # out_ref:   (Bt, O_pad)       f32
    Bt, L, E = doc_ref.shape
    KE, Ftot = wconv_ref.shape
    max_fs = KE // E
    BtL = Bt * L

    # Fold batch into M.  L is a multiple of 8, so this sublane merge is
    # layout-preserving (no VMEM copy).
    x = doc_ref[...].reshape(BtL, E)                       # (BtL, E) f32

    # im2col along K: column block k holds x shifted up by k rows.  Rows that
    # wrap (across the end / across batch boundaries) only ever contribute to
    # time positions that the additive mask below removes, or meet zero
    # weights (taps k >= fsize of a branch).
    cols = [x]
    for k in range(1, max_fs):                             # small, static
        cols.append(pltpu.roll(x, shift=BtL - k, axis=0))  # == jnp.roll(x, -k)
    x_cat = jnp.concatenate(cols, axis=1)                  # (BtL, max_fs*E)

    # Single MXU push, K = max_fs*E (=128): bf16 operands, f32 accumulation.
    acc = jnp.dot(x_cat.astype(jnp.bfloat16), wconv_ref[...],
                  preferred_element_type=jnp.float32)      # (BtL, Ftot) f32

    # Mask invalid conv positions (per-branch tail + roll wraparound) with the
    # precomputed additive constant, then max-pool over time.
    acc3 = acc.reshape(Bt, L, Ftot) + mask_ref[...]        # broadcast over Bt
    pooled = jnp.max(acc3, axis=1)                         # (Bt, Ftot)
    # relu(max(conv) + b) == max(relu(conv + b)) since relu(.+b) is monotone.
    h = jnp.maximum(pooled + bconv_ref[...], 0.0)

    # Linear + softmax (dropout is identity at inference).  Padded class lanes
    # carry bias -1e30 -> exp underflows to exactly 0, so they do not perturb
    # the softmax sum and are sliced away in the wrapper.
    logits = jnp.dot(h.astype(jnp.bfloat16), fcw_ref[...],
                     preferred_element_type=jnp.float32) + fcb_ref[...]
    m = jnp.max(logits, axis=1, keepdims=True)
    e = jnp.exp(logits - m)
    s = jnp.sum(e, axis=1, keepdims=True)
    out_ref[...] = e * pl.reciprocal(s, approx=True)


# ---------------------------------------------------------------------------
# Weight packing (done once, outside the kernel).
# ---------------------------------------------------------------------------
def _pack_params(params, filter_sizes, n_filters, embedding_dim, doc_len, o_pad):
    max_fs = max(filter_sizes)
    ftot = n_filters * len(filter_sizes)

    # Conv weights, im2col layout: row k*E + e <-> (tap k, embedding chan e);
    # branch i occupies columns [i*n_filters, (i+1)*n_filters); taps k >= fs_i
    # are zero so roll wraparound contributes nothing to that branch.
    w_all = jnp.zeros((max_fs, embedding_dim, ftot), jnp.float32)
    for i, (w, fs) in enumerate(zip(params["conv_w"], filter_sizes)):
        w_all = w_all.at[:fs, :, i * n_filters:(i + 1) * n_filters].set(w)
    w_cat = w_all.reshape(max_fs * embedding_dim, ftot).astype(jnp.bfloat16)

    b_all = jnp.concatenate(params["conv_b"]).reshape(1, ftot).astype(jnp.float32)

    # Additive validity mask over (time, filter): a branch with filter size fs
    # has only doc_len - fs + 1 valid conv outputs.
    mask = np.zeros((doc_len, ftot), np.float32)
    for i, fs in enumerate(filter_sizes):
        mask[doc_len - fs + 1:, i * n_filters:(i + 1) * n_filters] = -1e30
    mask = jnp.asarray(mask)

    # FC weight/bias, lane-padded to o_pad for a lane-dense output store.
    o = params["fc_w"].shape[1]
    fc_w = jnp.zeros((ftot, o_pad), jnp.float32)
    fc_w = fc_w.at[:, :o].set(params["fc_w"]).astype(jnp.bfloat16)
    fc_b = jnp.full((1, o_pad), -1e30, jnp.float32)
    fc_b = fc_b.at[0, :o].set(params["fc_b"])
    return w_cat, b_all, mask, fc_w, fc_b


# ---------------------------------------------------------------------------
# Wrapper: single pallas_call over batch tiles.
# ---------------------------------------------------------------------------
def convnet_forward(doc, params, filter_sizes, n_filters, *, batch_tile=None):
    """doc: (B, L, E) f32. Returns softmax probabilities (B, output_dim) f32."""
    B, L, E = doc.shape
    max_fs = max(filter_sizes)
    assert max_fs <= L, "max(filter_sizes) must be <= doc_len (roll/mask trick)"
    Ftot = n_filters * len(filter_sizes)
    O = params["fc_w"].shape[1]
    O_pad = 128 * pl.cdiv(O, 128)

    wconv, bconv, mask, fcw, fcb = _pack_params(
        params, filter_sizes, n_filters, E, L, O_pad)

    if batch_tile is None:
        # Big tiles amortize the ~0.35us/grid-step overhead; for B > 512 keep
        # >= 2 grid steps so both v7x TensorCores get work on the parallel axis
        # (512 is also a multiple of 8, keeping the output block sublane-legal).
        batch_tile = B if B <= 512 else 512
    num_tiles = pl.cdiv(B, batch_tile)

    # Zero-pad the batch to a multiple of batch_tile so partial tiles never
    # read uninitialized (possibly Inf/NaN) rows; padded rows are discarded.
    B_pad = num_tiles * batch_tile
    if B_pad != B:
        doc = jnp.pad(doc, ((0, B_pad - B), (0, 0), (0, 0)))

    # VMEM budget: doc/out tiles are double-buffered by the pipeline; the
    # in-kernel im2col + accumulator live once.  Budgeted against v7x's
    # 64 MiB physical VMEM (v5e/v6e have 128 MiB).
    btl = batch_tile * L
    est = (2 * batch_tile * L * E * 4                      # doc tile x2 bufs
           + 2 * batch_tile * O_pad * 4                    # out tile x2 bufs
           + 2 * (max_fs * E * Ftot * 2 + Ftot * 4
                  + L * Ftot * 4 + Ftot * O_pad * 2 + O_pad * 4)  # weights
           + btl * max_fs * E * 6                          # im2col f32 + bf16
           + btl * Ftot * 12)                              # acc / masked acc
    vmem_limit = int(min(64 << 20, max(32 << 20, 2 * est)))

    out = pl.pallas_call(
        _fused_textcnn_kernel,
        out_shape=jax.ShapeDtypeStruct((B_pad, O_pad), jnp.float32),
        grid_spec=pltpu.PrefetchScalarGridSpec(
            num_scalar_prefetch=0,
            grid=(num_tiles,),
            in_specs=[
                pl.BlockSpec((batch_tile, L, E), lambda i: (i, 0, 0)),
                pl.BlockSpec((max_fs * E, Ftot), lambda i: (0, 0)),
                pl.BlockSpec((1, Ftot), lambda i: (0, 0)),
                pl.BlockSpec((L, Ftot), lambda i: (0, 0)),
                pl.BlockSpec((Ftot, O_pad), lambda i: (0, 0)),
                pl.BlockSpec((1, O_pad), lambda i: (0, 0)),
            ],
            out_specs=pl.BlockSpec((batch_tile, O_pad), lambda i: (i, 0)),
        ),
        compiler_params=pltpu.CompilerParams(
            dimension_semantics=("parallel",),
            vmem_limit_bytes=vmem_limit),
    )(doc, wconv, bconv, mask, fcw, fcb)

    # Strip lane/batch padding outside the kernel (store stays lane-dense).
    return out[:B, :O]


# ---------------------------------------------------------------------------
# Params + pure-JAX reference (PyTorch eval-mode semantics, f32 throughout).
# ---------------------------------------------------------------------------
def init_params(key, embedding_dim, n_filters, filter_sizes, output_dim):
    keys = jax.random.split(key, 2 * len(filter_sizes) + 2)
    conv_w, conv_b = [], []
    for i, fsize in enumerate(filter_sizes):
        # PyTorch Conv2d weight is (F, 1, fsize, E); stored here as (fsize, E, F).
        w = 0.1 * jax.random.normal(keys[2 * i],
                                    (fsize, embedding_dim, n_filters),
                                    dtype=jnp.float32)
        b = 0.1 * jax.random.normal(keys[2 * i + 1], (n_filters,),
                                    dtype=jnp.float32)
        conv_w.append(w)
        conv_b.append(b)
    fin = n_filters * len(filter_sizes)
    # PyTorch Linear weight is (O, Fin); stored here as W^T (Fin, O).
    fc_w = 0.1 * jax.random.normal(keys[-2], (fin, output_dim), dtype=jnp.float32)
    fc_b = 0.1 * jax.random.normal(keys[-1], (output_dim,), dtype=jnp.float32)
    return {"conv_w": conv_w, "conv_b": conv_b, "fc_w": fc_w, "fc_b": fc_b}


def convnet_reference(doc, params, filter_sizes):
    pooled = []
    for i, fsize in enumerate(filter_sizes):
        w, b = params["conv_w"][i], params["conv_b"][i]
        L = doc.shape[1]
        L_out = L - fsize + 1
        acc = jnp.zeros((doc.shape[0], L_out, w.shape[2]), jnp.float32)
        for k in range(fsize):
            acc += jnp.einsum("ble,ef->blf", doc[:, k:k + L_out, :], w[k])
        acc = jax.nn.relu(acc + b[None, None, :])
        pooled.append(jnp.max(acc, axis=1))
    cat = jnp.concatenate(pooled, axis=1)
    logits = cat @ params["fc_w"] + params["fc_b"]
    return jax.nn.softmax(logits, axis=1)


if __name__ == "__main__":
    batch = 2
    doc_len = 16
    embedding_dim = 32
    n_filters = 8
    filter_sizes = (2, 3, 4)
    output_dim = 4

    key = jax.random.PRNGKey(0)
    pkey, dkey = jax.random.split(key)
    params = init_params(pkey, embedding_dim, n_filters, filter_sizes, output_dim)
    doc = jax.random.normal(dkey, (batch, doc_len, embedding_dim), dtype=jnp.float32)

    out = convnet_forward(doc, params, filter_sizes, n_filters)
    out = jax.block_until_ready(out)

    ref = convnet_reference(doc, params, filter_sizes)
    assert out.shape == (batch, output_dim)
    # Tolerance covers bf16 MXU operands (f32 accumulation) + the EUP
    # approximate reciprocal in the softmax; the f32 reference is exact.
    assert jnp.allclose(out, ref, atol=2e-2, rtol=2e-2), "mismatch vs reference"

    print("KERNEL_OK")
</pallas_src>

<mosaic_0001>
module attributes {stable_mosaic.version = 11 : i64} {
  func.func @_fused_textcnn_kernel(%arg0: i32, %arg1: memref<2x16x32xf32, #tpu.memory_space<vmem>>, %arg2: memref<128x24xbf16, #tpu.memory_space<vmem>>, %arg3: memref<1x24xf32, #tpu.memory_space<vmem>>, %arg4: memref<16x24xf32, #tpu.memory_space<vmem>>, %arg5: memref<24x128xbf16, #tpu.memory_space<vmem>>, %arg6: memref<1x128xf32, #tpu.memory_space<vmem>>, %arg7: memref<2x128xf32, #tpu.memory_space<vmem>>) attributes {dimension_semantics = [#tpu.dimension_semantics<parallel>], iteration_bounds = array<i64: 1>, scalar_prefetch = 0 : i64, scratch_operands = 0 : i64, tpu.core_type = #tpu.core_type<tc>, window_params = [{transform_indices = @transform_0, window_bounds = array<i64: 2, 16, 32>}, {pipeline_mode = #tpu.pipeline_mode<synchronous>, transform_indices = @transform_1, window_bounds = array<i64: 128, 24>}, {pipeline_mode = #tpu.pipeline_mode<synchronous>, transform_indices = @transform_2, window_bounds = array<i64: 1, 24>}, {pipeline_mode = #tpu.pipeline_mode<synchronous>, transform_indices = @transform_3, window_bounds = array<i64: 16, 24>}, {pipeline_mode = #tpu.pipeline_mode<synchronous>, transform_indices = @transform_4, window_bounds = array<i64: 24, 128>}, {pipeline_mode = #tpu.pipeline_mode<synchronous>, transform_indices = @transform_5, window_bounds = array<i64: 1, 128>}, {transform_indices = @transform_6, window_bounds = array<i64: 2, 128>}]} {
    %c0 = arith.constant 0 : index
    %c0_0 = arith.constant 0 : index
    %c0_1 = arith.constant 0 : index
    %0 = vector.load %arg1[%c0, %c0_0, %c0_1] : memref<2x16x32xf32, #tpu.memory_space<vmem>>, vector<2x16x32xf32>
    %1 = vector.shape_cast %0 : vector<2x16x32xf32> to vector<32x32xf32>
    %c31_i32 = arith.constant 31 : i32
    %2 = tpu.dynamic_rotate %1 by %c31_i32 dim 0 : vector<32x32xf32>, i32 -> vector<32x32xf32>
    %c30_i32 = arith.constant 30 : i32
    %3 = tpu.dynamic_rotate %1 by %c30_i32 dim 0 : vector<32x32xf32>, i32 -> vector<32x32xf32>
    %c29_i32 = arith.constant 29 : i32
    %4 = tpu.dynamic_rotate %1 by %c29_i32 dim 0 : vector<32x32xf32>, i32 -> vector<32x32xf32>
    %5 = tpu.concatenate %1, %2, %3, %4 in 1 : vector<32x32xf32>, vector<32x32xf32>, vector<32x32xf32>, vector<32x32xf32> -> vector<32x128xf32>
    %6 = arith.truncf %5 : vector<32x128xf32> to vector<32x128xbf16>
    %c0_2 = arith.constant 0 : index
    %c0_3 = arith.constant 0 : index
    %7 = vector.load %arg2[%c0_2, %c0_3] : memref<128x24xbf16, #tpu.memory_space<vmem>>, vector<128x24xbf16>
    %cst = arith.constant dense<0.000000e+00> : vector<32x24xf32>
    %8 = tpu.matmul %6, %7, %cst {dimension_numbers = #tpu.dot_dimension_numbers<[1], [0], [0], [1], [0, 0, 1, 1], [], []>} : vector<32x128xbf16>, vector<128x24xbf16>, vector<32x24xf32> -> vector<32x24xf32>
    %9 = vector.shape_cast %8 : vector<32x24xf32> to vector<2x16x24xf32>
    %c0_4 = arith.constant 0 : index
    %c0_5 = arith.constant 0 : index
    %10 = vector.load %arg4[%c0_4, %c0_5] : memref<16x24xf32, #tpu.memory_space<vmem>>, vector<16x24xf32>
    %11 = vector.shape_cast %10 : vector<16x24xf32> to vector<1x16x24xf32>
    %12 = vector.broadcast %11 : vector<1x16x24xf32> to vector<2x16x24xf32>
    %13 = arith.addf %9, %12 : vector<2x16x24xf32>
    %cst_6 = arith.constant dense<0xFF800000> : vector<2x24xf32>
    %14 = vector.multi_reduction <maximumf>, %13, %cst_6 [1] : vector<2x16x24xf32> to vector<2x24xf32>
    %c0_7 = arith.constant 0 : index
    %c0_8 = arith.constant 0 : index
    %15 = vector.load %arg3[%c0_7, %c0_8] : memref<1x24xf32, #tpu.memory_space<vmem>>, vector<1x24xf32>
    %16 = vector.broadcast %15 : vector<1x24xf32> to vector<2x24xf32>
    %17 = arith.addf %14, %16 : vector<2x24xf32>
    %cst_9 = arith.constant 0.000000e+00 : f32
    %18 = vector.broadcast %cst_9 : f32 to vector<2x24xf32>
    %19 = arith.maximumf %17, %18 : vector<2x24xf32>
    %20 = arith.truncf %19 : vector<2x24xf32> to vector<2x24xbf16>
    %c0_10 = arith.constant 0 : index
    %c0_11 = arith.constant 0 : index
    %21 = vector.load %arg5[%c0_10, %c0_11] : memref<24x128xbf16, #tpu.memory_space<vmem>>, vector<24x128xbf16>
    %cst_12 = arith.constant dense<0.000000e+00> : vector<2x128xf32>
    %22 = tpu.matmul %20, %21, %cst_12 {dimension_numbers = #tpu.dot_dimension_numbers<[1], [0], [0], [1], [0, 0, 1, 1], [], []>} : vector<2x24xbf16>, vector<24x128xbf16>, vector<2x128xf32> -> vector<2x128xf32>
    %c0_13 = arith.constant 0 : index
    %c0_14 = arith.constant 0 : index
    %23 = vector.load %arg6[%c0_13, %c0_14] : memref<1x128xf32, #tpu.memory_space<vmem>>, vector<1x128xf32>
    %24 = vector.broadcast %23 : vector<1x128xf32> to vector<2x128xf32>
    %25 = arith.addf %22, %24 : vector<2x128xf32>
    %cst_15 = arith.constant dense<0xFF800000> : vector<2xf32>
    %26 = vector.multi_reduction <maximumf>, %25, %cst_15 [1] : vector<2x128xf32> to vector<2xf32>
    %27 = vector.shape_cast %26 : vector<2xf32> to vector<2x1xf32>
    %28 = vector.broadcast %27 : vector<2x1xf32> to vector<2x128xf32>
    %29 = arith.subf %25, %28 : vector<2x128xf32>
    %30 = math.exp %29 : vector<2x128xf32>
    %cst_16 = arith.constant dense<0.000000e+00> : vector<2xf32>
    %31 = vector.multi_reduction <add>, %30, %cst_16 [1] : vector<2x128xf32> to vector<2xf32>
    %32 = vector.shape_cast %31 : vector<2xf32> to vector<2x1xf32>
    %33 = tpu.reciprocal %32 {approx = true} : vector<2x1xf32> -> vector<2x1xf32>
    %34 = vector.broadcast %33 : vector<2x1xf32> to vector<2x128xf32>
    %35 = arith.mulf %30, %34 : vector<2x128xf32>
    %c0_17 = arith.constant 0 : index
    %c0_18 = arith.constant 0 : index
    %36 = vector.load %arg7[%c0_17, %c0_18] : memref<2x128xf32, #tpu.memory_space<vmem>>, vector<2x128xf32>
    tpu.vector_store %arg7[%c0_17, %c0_18], %35 {strides = array<i32>} : memref<2x128xf32, #tpu.memory_space<vmem>>, vector<2x128xf32>,
    return
  }
  func.func @transform_0(%arg0: i32) -> (i32, i32, i32) {
    %c0_i32 = arith.constant 0 : i32
    %c0_i32_0 = arith.constant 0 : i32
    %c0_i32_1 = arith.constant 0 : i32
    return %arg0, %c0_i32, %c0_i32_0 : i32, i32, i32
  }
  func.func @transform_1(%arg0: i32) -> (i32, i32) {
    %c0_i32 = arith.constant 0 : i32
    %c0_i32_0 = arith.constant 0 : i32
    %c0_i32_1 = arith.constant 0 : i32
    return %c0_i32, %c0_i32_0 : i32, i32
  }
  func.func @transform_2(%arg0: i32) -> (i32, i32) {
    %c0_i32 = arith.constant 0 : i32
    %c0_i32_0 = arith.constant 0 : i32
    %c0_i32_1 = arith.constant 0 : i32
    return %c0_i32, %c0_i32_0 : i32, i32
  }
  func.func @transform_3(%arg0: i32) -> (i32, i32) {
    %c0_i32 = arith.constant 0 : i32
    %c0_i32_0 = arith.constant 0 : i32
    %c0_i32_1 = arith.constant 0 : i32
    return %c0_i32, %c0_i32_0 : i32, i32
  }
  func.func @transform_4(%arg0: i32) -> (i32, i32) {
    %c0_i32 = arith.constant 0 : i32
    %c0_i32_0 = arith.constant 0 : i32
    %c0_i32_1 = arith.constant 0 : i32
    return %c0_i32, %c0_i32_0 : i32, i32
  }
  func.func @transform_5(%arg0: i32) -> (i32, i32) {
    %c0_i32 = arith.constant 0 : i32
    %c0_i32_0 = arith.constant 0 : i32
    %c0_i32_1 = arith.constant 0 : i32
    return %c0_i32, %c0_i32_0 : i32, i32
  }
  func.func @transform_6(%arg0: i32) -> (i32, i32) {
    %c0_i32 = arith.constant 0 : i32
    %c0_i32_0 = arith.constant 0 : i32
    return %arg0, %c0_i32 : i32, i32
  }
}

</mosaic_0001>

<bundles_post_ra>
// kernel: tpu_custom_call.1
= control target key start
LH: loop header
LB: loop body
LE: loop exit
PB: predicated region body
PF: predicated region fallthrough
CT: control target
= control target key end

     0   :  { %v33_v3 = vlaneseq  ;;  %s583_s0 = inlined_call_operand.vmem [shape: f32[2,16,32], index: 0, kind: input, shape index: {}]   ;;  %s584_s1 = inlined_call_operand.vmem [shape: bf16[128,24], index: 1, kind: input, shape index: {}]   ;;  %s585_s2 = inlined_call_operand.vmem [shape: f32[1,24], index: 2, kind: input, shape index: {}]   ;;  %s586_s3 = inlined_call_operand.vmem [shape: f32[16,24], index: 3, kind: input, shape index: {}]   ;;  %s587_s4 = inlined_call_operand.vmem [shape: bf16[24,128], index: 4, kind: input, shape index: {}]   ;;  %s588_s5 = inlined_call_operand.vmem [shape: f32[1,128], index: 5, kind: input, shape index: {}]   ;;  %s589_s6 = inlined_call_operand.hbm [shape: f32[2,128], index: 6, kind: output, shape index: {}]  }
   0x1   :  { %v476_v0 = vld [vmem:[%s583_s0] sm:$0xff]  ;;  %v481_v1 = vld [vmem:[%s583_s0 + $0x10] sm:$0xff]  ;;  %v486_v2 = vld [vmem:[%s583_s0 + $0x18] sm:$0xff] }
   0x2   :  { %v49_v4 = vrot.slane %v476_v0, 3  ;;  %v51_v5 = vrot.slane %v481_v1, 3  ;;  %v52_v6 = vrot.slane %v486_v2, 3  ;;  %v29_v7 = vrot.slane %v476_v0, 1  ;;  %v495_v8 = vld [vmem:[%s583_s0 + $0x8] sm:$0xff]  ;;  %v358_v12 = vld [vmem:[%s584_s1 + $0x38] sm:$0xff] }
   0x3   :  { %v34_v9 = vshrl.u32 %v33_v3, 7  ;;  %v31_v10 = vrot.slane %v481_v1, 1  ;;  %v32_v11 = vrot.slane %v486_v2, 1  ;;  %v40_v13 = vrot.slane %v476_v0, 2  ;;  %360 = vmatpush.bf16.msra.mxu2 %v358_v12  ;;  %187 = vmatpush.bf16.msra.mxu0 %v358_v12  ;;  %v357_v18 = vld [vmem:[%s584_s1 + $0x30] sm:$0xff] }
   0x4   :  { %v42_v14 = vrot.slane %v481_v1, 2  ;;  %v43_v15 = vrot.slane %v486_v2, 2  ;;  %v41_v16 = vrot.slane %v495_v8, 2  ;;  %v30_v17 = vrot.slane %v495_v8, 1 }
   0x5   :  { %vm53_vm0 = vcmp.lt.s32.totalorder %v34_v9, 5  ;;  %vm35_vm1 = vcmp.lt.s32.totalorder %v34_v9, 7  ;;  %vm44_vm2 = vcmp.lt.s32.totalorder %v34_v9, 6 }
   0x6   :  { %v54_v19 = vsel %vm53_vm0, %v51_v5, %v52_v6  ;;  %v57_v20 = vsel %vm53_vm0, %v52_v6, %v49_v4  ;;  %v36_v21 = vsel %vm35_vm1, %v31_v10, %v32_v11  ;;  %v39_v22 = vsel %vm35_vm1, %v32_v11, %v29_v7 }
   0x7   :  { %11 = vsyncpa [#allocation3], 0  ;;  %v382_v23 = vpack.i.bf16 %v57_v20, %v54_v19  ;;  %v372_v24 = vpack.i.bf16 %v39_v22, %v36_v21  ;;  %v46_v25 = vsel %vm44_vm2, %v41_v16, %v42_v14  ;;  %s434_s8 = smov 96   ;;  %s435_s9 = smov 32   ;;  %v45_v26 = vsel %vm44_vm2, %v42_v14, %v43_v15  ;;  %361 = vmatpush.bf16.msra.mxu2 %v357_v18  ;;  %v356_v33 = vld [vmem:[%s584_s1 + $0x28] sm:$0xff]  ;;  %v355_v38 = vld [vmem:[%s584_s1 + $0x20] sm:$0xff] }
   0x8   :  { %v48_v27 = vsel %vm44_vm2, %v43_v15, %v40_v13  ;;  %v47_v28 = vsel %vm44_vm2, %v40_v13, %v41_v16  ;;  %v50_v29 = vrot.slane %v495_v8, 3  ;;  %v37_v30 = vsel %vm35_vm1, %v30_v17, %v31_v10  ;;  %188 = vmatpush.bf16.msra.mxu0 %v357_v18  ;;  %s436_s12 = smov 64   ;;  %v354_v40 = vld [vmem:[%s584_s1 + $0x18] sm:$0xff]  ;;  %v353_v41 = vld [vmem:[%s584_s1 + $0x10] sm:$0xff]  ;;  %v352_v42 = vld [vmem:[%s584_s1 + $0x8] sm:$0xff]  ;;  %s437_s0 = smov [#allocation2]  }
   0x9   :  { %383 = vrot.lane.b32.xlu1 %v382_v23, %s434_s8  ;;  %373 = vrot.lane.b32.xlu0 %v372_v24, %s435_s9  ;;  %v38_v31 = vsel %vm35_vm1, %v29_v7, %v30_v17  ;;  %v392_v32 = vpack.i.bf16 %v46_v25, %v47_v28  ;;  %v377_v34 = vpack.i.bf16 %v48_v27, %v45_v26  ;;  %v351_v43 = vld [vmem:[%s584_s1] sm:$0xff]  ;;  %vm106_vm3 = vcmask 261120   ;;  %v207_v20 = vld [vmem:[%s586_s3 + $0x8] sm:$0xff]  ;;  %s303_s7 = sshll.u32 %s437_s0, 4  ;;  %s304_s7 = int_to_ptr.vmem [resolvable:$true] %s303_s7 }
   0xa   :  { %v387_v35 = vpack.i.bf16 %v37_v30, %v38_v31  ;;  %v55_v36 = vsel %vm53_vm0, %v50_v29, %v51_v5  ;;  %v56_v37 = vsel %vm53_vm0, %v49_v4, %v50_v29  ;;  %vm111_vm4 = vcmask 523264   ;;  %v359_v17 = vld [vmem:[%s587_s4] sm:$0xff] }
   0xb   :  { %393 = vrot.lane.b32.xlu2 %v392_v32, %s436_s12  ;;  %362 = vmatpush.bf16.msra.mxu2 %v356_v33  ;;  %v397_v39 = vpack.i.bf16 %v55_v36, %v56_v37  ;;  %vm116_vm5 = vcmask 785408   ;;  %vm268_vm6 = vcmask 1043456   ;;  %v206_v18 = vld [vmem:[%s586_s3] sm:$0xff]  ;;  %vm212_vm7 = vcmask 195584  }
   0xc   :  { %189 = vmatpush.bf16.msra.mxu0 %v356_v33  ;;  %vm253_vm8 = vcmask 1041409   ;;  %vm285_vm9 = vcmask 1041408  }
   0xf   :  { %363 = vmatpush.bf16.msra.mxu2 %v355_v38 }
  0x10   :  { %190 = vmatpush.bf16.msra.mxu0 %v355_v38 }
  0x11   :  { %378 = vrot.lane.b32.xlu0 %v377_v34, %s436_s12  ;;  %388 = vrot.lane.b32.xlu1 %v387_v35, %s435_s9 }
  0x13   :  { %398 = vrot.lane.b32.xlu2 %v397_v39, %s434_s8  ;;  %364 = vmatpush.bf16.msra.mxu2 %v354_v40 }
  0x14   :  { %191 = vmatpush.bf16.msra.mxu0 %v354_v40 }
  0x17   :  { %365 = vmatpush.bf16.msra.mxu2 %v353_v41 }
  0x18   :  { %192 = vmatpush.bf16.msra.mxu0 %v353_v41  ;;  %v402_v41 = vld [vmem:[%s585_s2] ss:$0 sm:$0xff] }
  0x1b   :  { %366 = vmatpush.bf16.msra.mxu2 %v352_v42 }
  0x1c   :  { %193 = vmatpush.bf16.msra.mxu0 %v352_v42 }
  0x1f   :  { %367 = vmatpush.bf16.msra.mxu2 %v351_v43 }
  0x20   :  { %194 = vmatpush.bf16.msra.mxu0 %v351_v43 }
  0x65   :  { %v394_v44 = vpop.permute.xlu2 %393 }
  0x66   :  { %v396_v50 = vunpack.i.h.bf16 %v394_v44  ;;  %v395_v51 = vunpack.i.l.bf16 %v394_v44 }
  0x6d   :  { %v399_v47 = vpop.permute.xlu2 %398 }
  0x6e   :  { %v401_v54 = vunpack.i.h.bf16 %v399_v47  ;;  %v400_v55 = vunpack.i.l.bf16 %v399_v47 }
  0x7b   :  { %v384_v45 = vpop.permute.xlu1 %383  ;;  %v374_v46 = vpop.permute.xlu0 %373 }
  0x7c   :  { %v376_v48 = vunpack.i.h.bf16 %v374_v46  ;;  %v375_v49 = vunpack.i.l.bf16 %v374_v46  ;;  %v386_v60 = vunpack.i.h.bf16 %v384_v45  ;;  %v385_v61 = vunpack.i.l.bf16 %v384_v45 }
  0x7e   :  { %v110_v62 = vsel %vm106_vm3, %v486_v2, %v376_v48  ;;  %v109_v63 = vsel %vm106_vm3, %v481_v1, %v375_v49 }
  0x83   :  { %v379_v52 = vpop.permute.xlu0 %378  ;;  %v389_v53 = vpop.permute.xlu1 %388 }
  0x84   :  { %v381_v56 = vunpack.i.h.bf16 %v379_v52  ;;  %v380_v57 = vunpack.i.l.bf16 %v379_v52  ;;  %v391_v58 = vunpack.i.h.bf16 %v389_v53  ;;  %v390_v59 = vunpack.i.l.bf16 %v389_v53 }
  0x86   :  { %v108_v3 = vsel %vm106_vm3, %v495_v8, %v391_v58  ;;  %v107_v4 = vsel %vm106_vm3, %v476_v0, %v390_v59  ;;  %v114_v5 = vsel %vm111_vm4, %v109_v63, %v380_v57  ;;  %v115_v6 = vsel %vm111_vm4, %v110_v62, %v381_v56  ;;  %v243_v0 = vld [vmem:[%s587_s4 + $0x8] sm:$0xf]  ;;  %v403_v57 = vld [vmem:[%s588_s5] ss:$0 sm:$0xff]  ;;  %s305_s5 = sshll.u32 %s589_s6, 4  ;;  %s306_s5 = int_to_ptr.hbm [resolvable:$true] %s305_s5 }
  0x87   :  { %v119_v7 = vsel %vm116_vm5, %v114_v5, %v385_v61  ;;  %v120_v9 = vsel %vm116_vm5, %v115_v6, %v386_v60  ;;  %v112_v10 = vsel %vm111_vm4, %v107_v4, %v395_v51  ;;  %v113_v2 = vsel %vm111_vm4, %v108_v3, %v396_v50 }
  0x88   :  { %v122_v11 = vpack.c.bf16 %v120_v9, %v119_v7  ;;  %v117_v1 = vsel %vm116_vm5, %v112_v10, %v400_v55  ;;  %v118_v8 = vsel %vm116_vm5, %v113_v2, %v401_v54  ;;  %v261_v13 = vunpack.c.l.b16 %v243_v0 }
  0x89   :  { %v121_v12 = vpack.c.bf16 %v118_v8, %v117_v1 }
  0x8a   :  { %200 = vmatmul.bf16.vlgmr.msra.gmra.mxu2 %v122_v11  ;;  %v263_v15 = vpack.c.b16 %v261_v13, %v261_v13 }
  0x8b   :  { %195 = vmatmul.bf16.vlgmr.msra.gmra.mxu0 %v121_v12 }
  0x8c   :  { %v270_v16 = vsel %vm268_vm6, %v263_v15, 0 }
  0x8d   :  { %278 = vmatpush.bf16.msra.mxu1 %v270_v16 }
  0x91   :  { %279 = vmatpush.bf16.msra.mxu1 %v359_v17 }
 0x108   :  { %v196_v14 = vpop.f32.mrf.mxu0 }
 0x109   :  { %v208_v21 = vadd.f32 %v206_v18, %v196_v14 }
 0x10b   :  { %v213_v24 = vsel %vm212_vm7, %v208_v21, -inf }
 0x10d   :  { %v201_v19 = vpop.f32.mrf.mxu2 }
 0x10e   :  { %v210_v26 = vadd.f32 %v206_v18, %v201_v19 }
 0x110   :  { %v198_v22 = vpop.f32.mrf.mxu0  ;;  %v222_v31 = vsel %vm212_vm7, %v210_v26, -inf }
 0x111   :  { %v209_v23 = vadd.f32 %v207_v20, %v198_v22 }
 0x113   :  { %v214_v25 = vsel %vm212_vm7, %v209_v23, -inf }
 0x114   :  { %v215_v27 = vmax.f32 %v213_v24, %v214_v25 }
 0x115   :  { %v203_v28 = vpop.f32.mrf.mxu2 }
 0x116   :  { %v216_v29 = vrot.slane %v215_v27, 4  ;;  %v211_v30 = vadd.f32 %v207_v20, %v203_v28 }
 0x118   :  { %v217_v32 = vmax.f32 %v215_v27, %v216_v29  ;;  %v223_v33 = vsel %vm212_vm7, %v211_v30, -inf }
 0x119   :  { %v224_v34 = vmax.f32 %v222_v31, %v223_v33 }
 0x11a   :  { %v218_v35 = vrot.slane %v217_v32, 2 }
 0x11b   :  { %v225_v36 = vrot.slane %v224_v34, 4 }
 0x11c   :  { %v219_v37 = vmax.f32 %v217_v32, %v218_v35 }
 0x11d   :  { %v226_v38 = vmax.f32 %v224_v34, %v225_v36 }
 0x11e   :  { %v220_v39 = vrot.slane %v219_v37, 1 }
 0x11f   :  { %v227_v40 = vrot.slane %v226_v38, 2 }
 0x120   :  { %v221_v42 = vmax.f32 %v219_v37, %v220_v39 }
 0x121   :  { %v228_v43 = vmax.f32 %v226_v38, %v227_v40 }
 0x122   :  { %v235_v45 = vadd.f32 %v402_v41, %v221_v42 }
 0x123   :  { %v229_v44 = vrot.slane %v228_v43, 1 }
 0x124   :  { %v237_v48 = vmax.f32 %v235_v45, 0.0 }
 0x125   :  { %v230_v46 = vmax.f32 %v228_v43, %v229_v44 }
 0x126   :  { %v239_v50 = vpack.c.bf16 %v237_v48, %v237_v48 }
 0x127   :  { %v236_v47 = vadd.f32 %v402_v41, %v230_v46 }
 0x128   :  { %v250_v53 = vunpack.c.l.b16 %v239_v50 }
 0x129   :  { %v238_v49 = vmax.f32 %v236_v47, 0.0 }
 0x12b   :  { %v240_v51 = vpack.c.bf16 %v238_v49, %v238_v49 }
 0x12d   :  { %v251_v52 = vunpack.c.l.b16 %v240_v51 }
 0x12f   :  { %v252_v54 = vrot.slane %v251_v52, 7 }
 0x131   :  { %v254_v55 = vsel %vm253_vm8, %v252_v54, %v250_v53 }
 0x132   :  { %v255_v56 = vpack.c.b16 %v254_v55, %v254_v55 }
 0x134   :  { %350 = vmatmul.msk.bf16.vlgmr.msra.gmra.mxu1 %vm212_vm7, %v255_v56 }
 0x1b1   :  { %v281_v58 = vpop.f32.mrf.mxu1 }
 0x1b2   :  { %v282_v59 = vadd.f32 %v403_v57, %v281_v58 }
 0x1b4   :  { %v286_v60 = vsel %vm285_vm9, %v282_v59, -inf }
 0x1b5   :  { %287 = vmax.xlane.f32.xlu0 %v286_v60 }
 0x1b9   :  { %v283_v61 = vpop.f32.mrf.mxu1 }
 0x228   :  { %v288_v62 = vpop.xlane.xlu0 %287 }
 0x229   :  { %v289_v63 = vsub.f32 %v282_v59, %v288_v62 }
 0x22b   :  { %v290_v3 = vmul.f32 1.442695, %v289_v63 }
 0x22d   :  { %404 = vpow2.f32 %v290_v3 }
 0x233   :  { %v405_v4 = vpop.eup %404 }
 0x234   :  { %v292_v5 = vsel %vm285_vm9, %v405_v4, 0.0 }
 0x235   :  { %293 = vadd.xlane.f32.xlu1 %v292_v5 }
 0x2a8   :  { %v294_v6 = vpop.xlane.xlu1 %293 }
 0x2a9   :  { %406 = vrcp.f32 %v294_v6 }
 0x2af   :  { %v407_v7 = vpop.eup %406 }
 0x2b0   :  { %v296_v9 = vmul.f32 %v407_v7, %v405_v4 }
 0x2b2   :  { %297 = vst [vmem:[#allocation2] sm:$0x3] %v296_v9 }
 0x2b3   :  { %308 = dma.vmem_to_hbm [thread:$0]  %s304_s7, 32, %s306_s5, [#allocation3]  }
 0x2b4   :  { %432 = dma.done.wait [#allocation3], 32  }
 0x2b5   :  { %433 = vsyncadd [#allocation3], 4294967264 }
 0x2b6   :  { %313 = vsyncpa [#allocation3], 1 }

</bundles_post_ra>
